<compile_context>
chip_gen: v7x
topology: tpu7x:2x2x1
jax: 0.10.0
libtpu: 0.0.40
codegen_flags: <defaults>
</compile_context>

<pallas_src>
import functools

import jax
import jax.numpy as jnp
from jax.experimental import pallas as pl
from jax.experimental.pallas import tpu as pltpu


def _round_up(n, m):
    return ((n + m - 1) // m) * m


def _softplus(x):
    # Matches torch.nn.Softplus (beta=1, threshold=20): x if x > 20 else log1p(exp(x)).
    return jnp.where(x > 20.0, x, jnp.log1p(jnp.exp(jnp.minimum(x, 20.0))))


def r_sep_dnn_kernel(
    x_ref, w1_ref, b1_ref, w2_ref, b2_ref, w3_ref, b3_ref, out_ref,
    *, h_mu0, h_mu1,
):
    x = x_ref[...]  # (tile_b, D_in)

    # ---- Fused layer 1: x @ [w1_mu | w1_tau] + [b1_mu | b1_tau] -> (tile_b, H_mu0+H_tau0)
    z1 = jnp.dot(x, w1_ref[...], preferred_element_type=jnp.float32) + b1_ref[...]
    lane1 = jax.lax.broadcasted_iota(jnp.int32, z1.shape, 1)
    # ReLU on mu lanes [0:H_mu0], Softplus on tau lanes [H_mu0:] (lane mask, no slicing).
    a1 = jnp.where(lane1 < h_mu0, jnp.maximum(z1, 0.0), _softplus(z1))
    # Dropout(0.2) is identity in eval mode.

    # ---- Fused layer 2 (block-diagonal): [h0 | t0] @ blockdiag(w2_mu, w2_tau) -> [h1 | tau]
    z2 = jnp.dot(a1.astype(w2_ref.dtype), w2_ref[...],
                 preferred_element_type=jnp.float32) + b2_ref[...]
    lane2 = jax.lax.broadcasted_iota(jnp.int32, z2.shape, 1)
    a2 = jnp.where(lane2 < h_mu1, jnp.maximum(z2, 0.0), z2)  # ReLU only on mu-branch lanes

    # ---- Fused layer 3: [h1 | tau] @ blockdiag(w3_mu, I) + [b3_mu | 0] -> [mu | tau]
    z3 = jnp.dot(a2.astype(w3_ref.dtype), w3_ref[...],
                 preferred_element_type=jnp.float32) + b3_ref[...]
    out_ref[...] = z3.astype(out_ref.dtype)


def _pack_params(params, compute_dtype):
    """Fuse the two branches' weights into 3 lane-dense arrays (done once per call;
    in production you would precompute these)."""
    w1m, b1m = params["w1m"], params["b1m"]
    w2m, b2m = params["w2m"], params["b2m"]
    w3m, b3m = params["w3m"], params["b3m"]
    w1t, b1t = params["w1t"], params["b1t"]
    w2t, b2t = params["w2t"], params["b2t"]

    H_mu0 = w1m.shape[1]
    H_tau0 = w1t.shape[1]
    H_mu1 = w2m.shape[1]
    D_out = w3m.shape[1]

    # Layer 1: concat along the output (lane) dim.
    w1 = jnp.concatenate([w1m, w1t], axis=1)                      # (D_in, H_mu0+H_tau0)
    b1 = jnp.concatenate([b1m, b1t], axis=1)                      # (1, H_mu0+H_tau0)

    # Layer 2: block-diagonal -> output [h1 | tau].
    w2 = jnp.zeros((H_mu0 + H_tau0, H_mu1 + D_out), jnp.float32)
    w2 = w2.at[:H_mu0, :H_mu1].set(w2m)
    w2 = w2.at[H_mu0:, H_mu1:].set(w2t)
    b2 = jnp.concatenate([b2m, b2t], axis=1)                      # (1, H_mu1+D_out)

    # Layer 3: block-diagonal with identity pass-through for tau -> output [mu | tau].
    w3 = jnp.zeros((H_mu1 + D_out, 2 * D_out), jnp.float32)
    w3 = w3.at[:H_mu1, :D_out].set(w3m)
    w3 = w3.at[H_mu1:, D_out:].set(jnp.eye(D_out, dtype=jnp.float32))
    b3 = jnp.concatenate([b3m, jnp.zeros((1, D_out), jnp.float32)], axis=1)

    w1 = w1.astype(compute_dtype)
    w2 = w2.astype(compute_dtype)
    w3 = w3.astype(compute_dtype)
    # Biases stay f32: they are added to the f32 MXU accumulator.
    return (w1, b1, w2, b2, w3, b3), (H_mu0, H_mu1, D_out)


def r_sep_dnn_forward(x, params, *, tile_b=None, compute_dtype=jnp.float32):
    """x: (B, D_in). params: dict of (in,out) weights / (1,out) biases. Returns (mu, tau)."""
    B, D_in = x.shape
    (w1, b1, w2, b2, w3, b3), (H_mu0, H_mu1, D_out) = _pack_params(params, compute_dtype)

    # --- Batch tiling: multiple of 8 rows; default caps at 512 rows/tile so large
    # batches get a multi-step, pipelined, megacore-shardable grid.
    if tile_b is None:
        tile_b = min(512, _round_up(B, 8))
    tile_b = max(8, _round_up(tile_b, 8))
    B_pad = _round_up(B, tile_b)
    x = x.astype(compute_dtype)
    if B_pad != B:
        x = jnp.pad(x, ((0, B_pad - B), (0, 0)))
    grid = (B_pad // tile_b,)

    def full(arr):
        # Small constant weights/biases: full-array block, same block every grid step.
        return pl.BlockSpec(arr.shape, lambda i: (0, 0))

    x_spec = pl.BlockSpec((tile_b, D_in), lambda i: (i, 0))
    out_spec = pl.BlockSpec((tile_b, 2 * D_out), lambda i: (i, 0))

    kernel = functools.partial(r_sep_dnn_kernel, h_mu0=H_mu0, h_mu1=H_mu1)

    out = pl.pallas_call(
        kernel,
        out_shape=jax.ShapeDtypeStruct((B_pad, 2 * D_out), jnp.float32),
        grid_spec=pltpu.PrefetchScalarGridSpec(
            num_scalar_prefetch=0,
            grid=grid,
            in_specs=[
                x_spec,
                full(w1), full(b1),
                full(w2), full(b2),
                full(w3), full(b3),
            ],
            out_specs=out_spec,
        ),
        compiler_params=pltpu.CompilerParams(
            dimension_semantics=("parallel",),
        ),
    )(x, w1, b1, w2, b2, w3, b3)

    mu = out[:B, :D_out]
    tau = out[:B, D_out:]
    return mu, tau


def init_params(key, D_in, H_mu, H_tau, D_out):
    """Deterministic init mimicking torch.nn.Linear default (uniform +-1/sqrt(fan_in)).
    Weights stored as (in, out); biases as (1, out)."""
    def linear(k, fan_in, fan_out):
        kw, kb = jax.random.split(k)
        bound = 1.0 / (fan_in ** 0.5)
        w = jax.random.uniform(kw, (fan_in, fan_out), jnp.float32, -bound, bound)
        b = jax.random.uniform(kb, (1, fan_out), jnp.float32, -bound, bound)
        return w, b

    keys = jax.random.split(key, 5)
    w1m, b1m = linear(keys[0], D_in, H_mu[0])
    w2m, b2m = linear(keys[1], H_mu[0], H_mu[1])
    w3m, b3m = linear(keys[2], H_mu[1], D_out)
    w1t, b1t = linear(keys[3], D_in, H_tau[0])
    w2t, b2t = linear(keys[4], H_tau[0], D_out)
    return dict(
        w1m=w1m, b1m=b1m, w2m=w2m, b2m=b2m, w3m=w3m, b3m=b3m,
        w1t=w1t, b1t=b1t, w2t=w2t, b2t=b2t,
    )


def _reference(x, p):
    """Pure-JAX reference of the PyTorch forward (eval mode)."""
    h = jnp.maximum(x @ p["w1m"] + p["b1m"], 0.0)
    h = jnp.maximum(h @ p["w2m"] + p["b2m"], 0.0)
    mu = h @ p["w3m"] + p["b3m"]
    t = _softplus(x @ p["w1t"] + p["b1t"])
    tau = t @ p["w2t"] + p["b2t"]
    return mu, tau


if __name__ == "__main__":
    # Small shapes consistent with the module: x is (batch, D_in).
    B, D_in = 200, 32
    H_mu = (64, 32)
    H_tau = (64,)
    D_out = 16

    key = jax.random.PRNGKey(0)
    kx, kp = jax.random.split(key)
    x = jax.random.normal(kx, (B, D_in), dtype=jnp.float32)
    params = init_params(kp, D_in, H_mu, H_tau, D_out)

    mu_ref, tau_ref = _reference(x, params)

    # Multi-step grid: tile_b=64 -> batch padded 200->256 rows, grid=(4,), pipelined.
    mu, tau = r_sep_dnn_forward(x, params, tile_b=64)
    jax.block_until_ready((mu, tau))
    assert mu.shape == (B, D_out) and tau.shape == (B, D_out)
    assert jnp.allclose(mu, mu_ref, atol=5e-4, rtol=5e-4)
    assert jnp.allclose(tau, tau_ref, atol=5e-4, rtol=5e-4)

    # Default tile selection path (single tile here since B is small).
    mu2, tau2 = r_sep_dnn_forward(x, params)
    jax.block_until_ready((mu2, tau2))
    assert jnp.allclose(mu2, mu_ref, atol=5e-4, rtol=5e-4)
    assert jnp.allclose(tau2, tau_ref, atol=5e-4, rtol=5e-4)

    print("KERNEL_OK")
</pallas_src>

<mosaic_0001>
module attributes {stable_mosaic.version = 11 : i64} {
  func.func @r_sep_dnn_kernel(%arg0: i32, %arg1: memref<64x32xf32, #tpu.memory_space<vmem>>, %arg2: memref<32x128xf32, #tpu.memory_space<vmem>>, %arg3: memref<1x128xf32, #tpu.memory_space<vmem>>, %arg4: memref<128x48xf32, #tpu.memory_space<vmem>>, %arg5: memref<1x48xf32, #tpu.memory_space<vmem>>, %arg6: memref<48x32xf32, #tpu.memory_space<vmem>>, %arg7: memref<1x32xf32, #tpu.memory_space<vmem>>, %arg8: memref<64x32xf32, #tpu.memory_space<vmem>>) attributes {dimension_semantics = [#tpu.dimension_semantics<parallel>], iteration_bounds = array<i64: 4>, scalar_prefetch = 0 : i64, scratch_operands = 0 : i64, tpu.core_type = #tpu.core_type<tc>, window_params = [{transform_indices = @transform_0, window_bounds = array<i64: 64, 32>}, {pipeline_mode = #tpu.pipeline_mode<synchronous>, transform_indices = @transform_1, window_bounds = array<i64: 32, 128>}, {pipeline_mode = #tpu.pipeline_mode<synchronous>, transform_indices = @transform_2, window_bounds = array<i64: 1, 128>}, {pipeline_mode = #tpu.pipeline_mode<synchronous>, transform_indices = @transform_3, window_bounds = array<i64: 128, 48>}, {pipeline_mode = #tpu.pipeline_mode<synchronous>, transform_indices = @transform_4, window_bounds = array<i64: 1, 48>}, {pipeline_mode = #tpu.pipeline_mode<synchronous>, transform_indices = @transform_5, window_bounds = array<i64: 48, 32>}, {pipeline_mode = #tpu.pipeline_mode<synchronous>, transform_indices = @transform_6, window_bounds = array<i64: 1, 32>}, {transform_indices = @transform_7, window_bounds = array<i64: 64, 32>}]} {
    %c0 = arith.constant 0 : index
    %c0_0 = arith.constant 0 : index
    %0 = vector.load %arg1[%c0, %c0_0] : memref<64x32xf32, #tpu.memory_space<vmem>>, vector<64x32xf32>
    %c0_1 = arith.constant 0 : index
    %c0_2 = arith.constant 0 : index
    %1 = vector.load %arg2[%c0_1, %c0_2] : memref<32x128xf32, #tpu.memory_space<vmem>>, vector<32x128xf32>
    %cst = arith.constant dense<0.000000e+00> : vector<64x128xf32>
    %2 = tpu.matmul %0, %1, %cst {dimension_numbers = #tpu.dot_dimension_numbers<[1], [0], [0], [1], [0, 0, 1, 1], [], []>} : vector<64x32xf32>, vector<32x128xf32>, vector<64x128xf32> -> vector<64x128xf32>
    %c0_3 = arith.constant 0 : index
    %c0_4 = arith.constant 0 : index
    %3 = vector.load %arg3[%c0_3, %c0_4] : memref<1x128xf32, #tpu.memory_space<vmem>>, vector<1x128xf32>
    %4 = vector.broadcast %3 : vector<1x128xf32> to vector<64x128xf32>
    %5 = arith.addf %2, %4 : vector<64x128xf32>
    %6 = tpu.iota {dimensions = array<i32: 1>} : vector<64x128xi32>
    %c64_i32 = arith.constant 64 : i32
    %7 = vector.broadcast %c64_i32 : i32 to vector<64x128xi32>
    %8 = arith.cmpi slt, %6, %7 : vector<64x128xi32>
    %cst_5 = arith.constant 0.000000e+00 : f32
    %9 = vector.broadcast %cst_5 : f32 to vector<64x128xf32>
    %10 = arith.maximumf %5, %9 : vector<64x128xf32>
    %cst_6 = arith.constant 2.000000e+01 : f32
    %11 = vector.broadcast %cst_6 : f32 to vector<64x128xf32>
    %12 = arith.cmpf ogt, %5, %11 : vector<64x128xf32>
    %cst_7 = arith.constant 2.000000e+01 : f32
    %13 = vector.broadcast %cst_7 : f32 to vector<64x128xf32>
    %14 = arith.minimumf %5, %13 : vector<64x128xf32>
    %15 = math.exp %14 : vector<64x128xf32>
    %16 = math.log1p %15 : vector<64x128xf32>
    %17 = arith.select %12, %5, %16 : vector<64x128xi1>, vector<64x128xf32>
    %18 = arith.select %8, %10, %17 : vector<64x128xi1>, vector<64x128xf32>
    %c0_8 = arith.constant 0 : index
    %c0_9 = arith.constant 0 : index
    %19 = vector.load %arg4[%c0_8, %c0_9] : memref<128x48xf32, #tpu.memory_space<vmem>>, vector<128x48xf32>
    %cst_10 = arith.constant dense<0.000000e+00> : vector<64x48xf32>
    %20 = tpu.matmul %18, %19, %cst_10 {dimension_numbers = #tpu.dot_dimension_numbers<[1], [0], [0], [1], [0, 0, 1, 1], [], []>} : vector<64x128xf32>, vector<128x48xf32>, vector<64x48xf32> -> vector<64x48xf32>
    %c0_11 = arith.constant 0 : index
    %c0_12 = arith.constant 0 : index
    %21 = vector.load %arg5[%c0_11, %c0_12] : memref<1x48xf32, #tpu.memory_space<vmem>>, vector<1x48xf32>
    %22 = vector.broadcast %21 : vector<1x48xf32> to vector<64x48xf32>
    %23 = arith.addf %20, %22 : vector<64x48xf32>
    %24 = tpu.iota {dimensions = array<i32: 1>} : vector<64x48xi32>
    %c32_i32 = arith.constant 32 : i32
    %25 = vector.broadcast %c32_i32 : i32 to vector<64x48xi32>
    %26 = arith.cmpi slt, %24, %25 : vector<64x48xi32>
    %cst_13 = arith.constant 0.000000e+00 : f32
    %27 = vector.broadcast %cst_13 : f32 to vector<64x48xf32>
    %28 = arith.maximumf %23, %27 : vector<64x48xf32>
    %29 = arith.select %26, %28, %23 : vector<64x48xi1>, vector<64x48xf32>
    %c0_14 = arith.constant 0 : index
    %c0_15 = arith.constant 0 : index
    %30 = vector.load %arg6[%c0_14, %c0_15] : memref<48x32xf32, #tpu.memory_space<vmem>>, vector<48x32xf32>
    %cst_16 = arith.constant dense<0.000000e+00> : vector<64x32xf32>
    %31 = tpu.matmul %29, %30, %cst_16 {dimension_numbers = #tpu.dot_dimension_numbers<[1], [0], [0], [1], [0, 0, 1, 1], [], []>} : vector<64x48xf32>, vector<48x32xf32>, vector<64x32xf32> -> vector<64x32xf32>
    %c0_17 = arith.constant 0 : index
    %c0_18 = arith.constant 0 : index
    %32 = vector.load %arg7[%c0_17, %c0_18] : memref<1x32xf32, #tpu.memory_space<vmem>>, vector<1x32xf32>
    %33 = vector.broadcast %32 : vector<1x32xf32> to vector<64x32xf32>
    %34 = arith.addf %31, %33 : vector<64x32xf32>
    %c0_19 = arith.constant 0 : index
    %c0_20 = arith.constant 0 : index
    %35 = vector.load %arg8[%c0_19, %c0_20] : memref<64x32xf32, #tpu.memory_space<vmem>>, vector<64x32xf32>
    tpu.vector_store %arg8[%c0_19, %c0_20], %34 {strides = array<i32>} : memref<64x32xf32, #tpu.memory_space<vmem>>, vector<64x32xf32>,
    return
  }
  func.func @transform_0(%arg0: i32) -> (i32, i32) {
    %c0_i32 = arith.constant 0 : i32
    %c0_i32_0 = arith.constant 0 : i32
    return %arg0, %c0_i32 : i32, i32
  }
  func.func @transform_1(%arg0: i32) -> (i32, i32) {
    %c0_i32 = arith.constant 0 : i32
    %c0_i32_0 = arith.constant 0 : i32
    %c0_i32_1 = arith.constant 0 : i32
    return %c0_i32, %c0_i32_0 : i32, i32
  }
  func.func @transform_2(%arg0: i32) -> (i32, i32) {
    %c0_i32 = arith.constant 0 : i32
    %c0_i32_0 = arith.constant 0 : i32
    %c0_i32_1 = arith.constant 0 : i32
    return %c0_i32, %c0_i32_0 : i32, i32
  }
  func.func @transform_3(%arg0: i32) -> (i32, i32) {
    %c0_i32 = arith.constant 0 : i32
    %c0_i32_0 = arith.constant 0 : i32
    %c0_i32_1 = arith.constant 0 : i32
    return %c0_i32, %c0_i32_0 : i32, i32
  }
  func.func @transform_4(%arg0: i32) -> (i32, i32) {
    %c0_i32 = arith.constant 0 : i32
    %c0_i32_0 = arith.constant 0 : i32
    %c0_i32_1 = arith.constant 0 : i32
    return %c0_i32, %c0_i32_0 : i32, i32
  }
  func.func @transform_5(%arg0: i32) -> (i32, i32) {
    %c0_i32 = arith.constant 0 : i32
    %c0_i32_0 = arith.constant 0 : i32
    %c0_i32_1 = arith.constant 0 : i32
    return %c0_i32, %c0_i32_0 : i32, i32
  }
  func.func @transform_6(%arg0: i32) -> (i32, i32) {
    %c0_i32 = arith.constant 0 : i32
    %c0_i32_0 = arith.constant 0 : i32
    %c0_i32_1 = arith.constant 0 : i32
    return %c0_i32, %c0_i32_0 : i32, i32
  }
  func.func @transform_7(%arg0: i32) -> (i32, i32) {
    %c0_i32 = arith.constant 0 : i32
    %c0_i32_0 = arith.constant 0 : i32
    return %arg0, %c0_i32 : i32, i32
  }
}

</mosaic_0001>

<bundles_post_ra>
// kernel: tpu_custom_call.1
= control target key start
LH: loop header
LB: loop body
LE: loop exit
PB: predicated region body
PF: predicated region fallthrough
CT: control target
= control target key end

     0   :  { %s1222_s24 = smov 0   ;;  %s1507_s0 = inlined_call_operand.vmem [shape: f32[256,32], index: 0, kind: input, shape index: {}]   ;;  %s1508_s1 = inlined_call_operand.vmem [shape: f32[32,128], index: 1, kind: input, shape index: {}]   ;;  %s1509_s2 = inlined_call_operand.vmem [shape: f32[1,128], index: 2, kind: input, shape index: {}]   ;;  %s1510_s3 = inlined_call_operand.vmem [shape: f32[128,48], index: 3, kind: input, shape index: {}]   ;;  %s1511_s4 = inlined_call_operand.vmem [shape: f32[1,48], index: 4, kind: input, shape index: {}]   ;;  %s1512_s5 = inlined_call_operand.vmem [shape: f32[48,32], index: 5, kind: input, shape index: {}]   ;;  %s1513_s6 = inlined_call_operand.vmem [shape: f32[1,32], index: 6, kind: input, shape index: {}]   ;;  %s1514_s7 = inlined_call_operand.vmem [shape: f32[256,32], index: 7, kind: output, shape index: {}]  }
   0x1 LB: > { %s914_s25 = sadd.s32 4294967295, %s1180_s24   ;;  %p918_p0 = scmp.ge.s32.totalorder %s1180_s24, 1  ;;  %s1180_s24 = sphi %s1222_s24, %s17_s24  }
   0x2   : > { %p238_p1 = scmp.lt.s32.totalorder %s1180_s24, 5 }
   0x4   : > { %p239_p2 = pnand %p918_p0, %p238_p1 }
   0x5   : > { %v290_v0 = vld [vmem:[%s1508_s1] sm:$0xff] (!%p239_p2)  ;;  %v291_v1 = vld [vmem:[%s1508_s1 + $0x8] sm:$0xff] (!%p239_p2)  ;;  %v292_v2 = vld [vmem:[%s1508_s1 + $0x10] sm:$0xff] (!%p239_p2)  ;;  %s919_s9 = sshll.u32 (!%p239_p2), %s914_s25, 3  ;;  %vm301_vm0 = vcmask (!%p239_p2), 261120  }
   0x6   : > { %242 = sbr.rel (%p239_p2) target bundleno = 714 (0x2ca), region = 48  ;;  %v1082_v3 = vpack.c.bf16 (!%p239_p2), %v291_v1, %v290_v0  ;;  %v293_v4 = vld [vmem:[%s1508_s1 + $0x18] sm:$0xff] (!%p239_p2)  ;;  %p271_p3 = scmp.lt.s32.totalorder (!%p239_p2), %s919_s9, 31  ;;  %v562_v14 = vld [vmem:[%s1510_s3] sm:$0xff] (!%p239_p2)  ;;  %v563_v15 = vld [vmem:[%s1510_s3 + $0x8] sm:$0xff] (!%p239_p2) }
   0x7   : > { %v1086_v5 = vpack.c.bf16 (!%p239_p2), %v293_v4, %v292_v2  ;;  %v1090_v16 = vpack.c.bf16 (!%p239_p2), %v563_v15, %v562_v14  ;;  %v564_v17 = vld [vmem:[%s1510_s3 + $0x10] sm:$0xff] (!%p239_p2)  ;;  %v565_v18 = vld [vmem:[%s1510_s3 + $0x18] sm:$0xff] (!%p239_p2)  ;;  %v566_v20 = vld [vmem:[%s1510_s3 + $0x20] sm:$0xff] (!%p239_p2) }
   0x8   : > { %1083 = vmatprep.subr.bf16.mxu0 (!%p239_p2), %v1082_v3  ;;  %v1094_v19 = vpack.c.bf16 (!%p239_p2), %v565_v18, %v564_v17  ;;  %v567_v21 = vld [vmem:[%s1510_s3 + $0x28] sm:$0xff] (!%p239_p2)  ;;  %v568_v23 = vld [vmem:[%s1510_s3 + $0x30] sm:$0xff] (!%p239_p2)  ;;  %v569_v24 = vld [vmem:[%s1510_s3 + $0x38] sm:$0xff] (!%p239_p2) }
   0x9   : > { %1085 = vmatpush3.bf16.msra.mxu0 (!%p239_p2), %v1082_v3  ;;  %1091 = vmatprep.subr.bf16.mxu1 (!%p239_p2), %v1090_v16  ;;  %v1098_v22 = vpack.c.bf16 (!%p239_p2), %v567_v21, %v566_v20  ;;  %v1102_v25 = vpack.c.bf16 (!%p239_p2), %v569_v24, %v568_v23  ;;  %v570_v26 = vld [vmem:[%s1510_s3 + $0x40] sm:$0xff] (!%p239_p2)  ;;  %v571_v27 = vld [vmem:[%s1510_s3 + $0x48] sm:$0xff] (!%p239_p2)  ;;  %v572_v29 = vld [vmem:[%s1510_s3 + $0x50] sm:$0xff] (!%p239_p2) }
   0xa   : > { %1087 = vmatprep.subr.bf16.mxu0 (!%p239_p2), %v1086_v5  ;;  %1093 = vmatpush3.bf16.msra.mxu1 (!%p239_p2), %v1090_v16  ;;  %v1106_v28 = vpack.c.bf16 (!%p239_p2), %v571_v27, %v570_v26  ;;  %v573_v30 = vld [vmem:[%s1510_s3 + $0x58] sm:$0xff] (!%p239_p2)  ;;  %v574_v32 = vld [vmem:[%s1510_s3 + $0x60] sm:$0xff] (!%p239_p2)  ;;  %v575_v33 = vld [vmem:[%s1510_s3 + $0x68] sm:$0xff] (!%p239_p2) }
   0xb   : > { %1095 = vmatprep.subr.bf16.mxu1 (!%p239_p2), %v1094_v19  ;;  %v1110_v31 = vpack.c.bf16 (!%p239_p2), %v573_v30, %v572_v29  ;;  %v1114_v34 = vpack.c.bf16 (!%p239_p2), %v575_v33, %v574_v32  ;;  %v576_v35 = vld [vmem:[%s1510_s3 + $0x70] sm:$0xff] (!%p239_p2)  ;;  %v577_v36 = vld [vmem:[%s1510_s3 + $0x78] sm:$0xff] (!%p239_p2)  ;;  %v707_v38 = vld [vmem:[%s1512_s5] sm:$0xff] (!%p239_p2) }
   0xc   : > { %v1118_v37 = vpack.c.bf16 (!%p239_p2), %v577_v36, %v576_v35  ;;  %v708_v39 = vld [vmem:[%s1512_s5 + $0x8] sm:$0xff] (!%p239_p2)  ;;  %v709_v40 = vld [vmem:[%s1512_s5 + $0x10] sm:$0xff] (!%p239_p2)  ;;  %v710_v42 = vld [vmem:[%s1512_s5 + $0x18] sm:$0xff] (!%p239_p2) }
   0xd   : > { %s1524_s9 = smov (!%p271_p3, %s919_s9), 31  ;;  %1089 = vmatpush3.bf16.msra.mxu0 %v1086_v5  ;;  %v1122_v41 = vpack.c.bf16 %v708_v39, %v707_v38  ;;  %v1126_v43 = vpack.c.bf16 %v710_v42, %v709_v40  ;;  %v923_v44 = vld [vmem:[%s1509_s2] ss:$0 sm:$0xff] }
   0xe   : > { %s920_s12 = sshll.u32 %s1524_s9, 3  ;;  %1097 = vmatpush3.bf16.msra.mxu1 %v1094_v19 }
   0xf   : > { %s274_s15 = scalar_lea.vmem %s1507_s0, %s920_s12  ;;  %1099 = vmatprep.subr.bf16.mxu1 %v1098_v22  ;;  %1123 = vmatprep.subr.bf16.mxu0 %v1122_v41  ;;  %s280_s29 = scalar_lea.vmem %s1514_s7, %s920_s12 }
  0x10   : > { %v282_v6 = vld [vmem:[%s274_s15] sm:$0xff]  ;;  %v283_v7 = vld [vmem:[%s274_s15 + $0x8] sm:$0xff]  ;;  %v284_v8 = vld [vmem:[%s274_s15 + $0x10] sm:$0xff] }
  0x11   : > { %1002 = vmatprep.mubr.msk.f32.mxu0 %vm301_vm0, %v282_v6  ;;  %v285_v9 = vld [vmem:[%s274_s15 + $0x18] sm:$0xff]  ;;  %v286_v10 = vld [vmem:[%s274_s15 + $0x20] sm:$0xff]  ;;  %v287_v11 = vld [vmem:[%s274_s15 + $0x28] sm:$0xff] }
  0x12   : > { %1003 = vmatmul.mubr.msk.f32.vlgmr.msra.gmra.mrb[0].mxu0 %vm301_vm0, %v283_v7  ;;  %v288_v12 = vld [vmem:[%s274_s15 + $0x30] sm:$0xff]  ;;  %v289_v13 = vld [vmem:[%s274_s15 + $0x38] sm:$0xff]  ;;  %1101 = vmatpush3.bf16.msra.mxu1 %v1098_v22 }
  0x13   : > { %1005 = vmatprep.mubr.msk.f32.mxu0 %vm301_vm0, %v284_v8  ;;  %1103 = vmatprep.subr.bf16.mxu1 %v1102_v25 }
  0x14   : > { %1125 = vmatpush3.bf16.msra.mxu0 %v1122_v41 }
  0x15   : > { %1127 = vmatprep.subr.bf16.mxu0 %v1126_v43 }
  0x16   : > { %1006 = vmatmul.mubr.msk.f32.gmra.mrb[2].mxu0 %vm301_vm0, %v285_v9  ;;  %1105 = vmatpush3.bf16.msra.mxu1 %v1102_v25 }
  0x17   : > { %1008 = vmatprep.mubr.msk.f32.mxu0 %vm301_vm0, %v286_v10  ;;  %1107 = vmatprep.subr.bf16.mxu1 %v1106_v28 }
  0x18   : > { %1129 = vmatpush3.bf16.msra.mxu0 %v1126_v43 }
  0x1a   : > { %1009 = vmatmul.mubr.msk.f32.gmra.mrb[4].mxu0 %vm301_vm0, %v287_v11  ;;  %1109 = vmatpush3.bf16.msra.mxu1 %v1106_v28 }
  0x1b   : > { %1011 = vmatprep.mubr.msk.f32.mxu0 %vm301_vm0, %v288_v12  ;;  %1111 = vmatprep.subr.bf16.mxu1 %v1110_v31 }
  0x1e   : > { %1012 = vmatmul.mubr.msk.f32.gmra.mrb[6].mxu0 %vm301_vm0, %v289_v13  ;;  %1113 = vmatpush3.bf16.msra.mxu1 %v1110_v31  ;;  %v431_v13 = vlaneseq }
  0x1f   : > { %1115 = vmatprep.subr.bf16.mxu1 %v1114_v34 }
  0x20   : > { %v1345_v19 = vand.u32 127, %v431_v13 }
  0x22   : > { %1117 = vmatpush3.bf16.msra.mxu1 %v1114_v34  ;;  %vm433_vm1 = vcmp.lt.s32.totalorder %v1345_v19, 64 }
  0x23   : > { %1119 = vmatprep.subr.bf16.mxu1 %v1118_v37 }
  0x26   : > { %1121 = vmatpush3.bf16.msra.mxu1 %v1118_v37 }
  0xe5   : > { %v1004_v45 = vpop.f32.mrb[0].mxu0 }
  0xe6   : > { %v1321_v46 = vadd.f32 %v1004_v45, %v923_v44  ;;  %v392_v47 = vpop.f32.mrb[1].mxu0 }
  0xe7   : > { %v1323_v48 = vadd.f32 %v923_v44, %v392_v47 }
  0xe8   : > { %v451_v49 = vmin.f32 %v1321_v46, 20.0  ;;  %v435_v30 = vmax.f32 %v1321_v46, 0.0  ;;  %vm443_vm2 = vcmp.gt.f32.partialorder %v1321_v46, 20.0 }
  0xe9   : > { %v450_v50 = vmin.f32 %v1323_v48, 20.0  ;;  %v1007_v51 = vpop.f32.mrb[2].mxu0  ;;  %v434_v29 = vmax.f32 %v1323_v48, 0.0  ;;  %vm442_vm3 = vcmp.gt.f32.partialorder %v1323_v48, 20.0 }
  0xea   : > { %v460_v52 = vmul.f32 1.442695, %v451_v49  ;;  %v1327_v53 = vadd.f32 %v1007_v51, %v923_v44  ;;  %v402_v54 = vpop.f32.mrb[3].mxu0 }
  0xeb   : > { %v458_v55 = vmul.f32 1.442695, %v450_v50  ;;  %v1329_v56 = vadd.f32 %v923_v44, %v402_v54 }
  0xec   : > { %1142 = vpow2.f32 %v460_v52  ;;  %v453_v57 = vmin.f32 %v1327_v53, 20.0  ;;  %v437_v37 = vmax.f32 %v1327_v53, 0.0  ;;  %vm445_vm4 = vcmp.gt.f32.partialorder %v1327_v53, 20.0 }
  0xed   : > { %1144 = vpow2.f32 %v458_v55  ;;  %v452_v58 = vmin.f32 %v1329_v56, 20.0  ;;  %v1010_v59 = vpop.f32.mrb[4].mxu0  ;;  %v436_v40 = vmax.f32 %v1329_v56, 0.0  ;;  %vm444_vm6 = vcmp.gt.f32.partialorder %v1329_v56, 20.0 }
  0xee   : > { %v464_v60 = vmul.f32 1.442695, %v453_v57  ;;  %v1333_v61 = vadd.f32 %v1010_v59, %v923_v44  ;;  %v412_v62 = vpop.f32.mrb[5].mxu0 }
  0xef   : > { %v462_v63 = vmul.f32 1.442695, %v452_v58  ;;  %v1335_v0 = vadd.f32 %v923_v44, %v412_v62 }
  0xf0   : > { %1146 = vpow2.f32 %v464_v60  ;;  %v455_v1 = vmin.f32 %v1333_v61, 20.0  ;;  %vm447_vm9 = vcmp.gt.f32.partialorder %v1333_v61, 20.0 }
  0xf1   : > { %1148 = vpow2.f32 %v462_v63  ;;  %v454_v2 = vmin.f32 %v1335_v0, 20.0  ;;  %v1013_v3 = vpop.f32.mrb[6].mxu0  ;;  %vm446_vm13 = vcmp.gt.f32.partialorder %v1335_v0, 20.0 }
  0xf2   : > { %v468_v4 = vmul.f32 1.442695, %v455_v1  ;;  %v1339_v5 = vadd.f32 %v1013_v3, %v923_v44  ;;  %v422_v6 = vpop.f32.mrb[7].mxu0 }
  0xf3   : > { %v466_v7 = vmul.f32 1.442695, %v454_v2  ;;  %v1341_v8 = vadd.f32 %v923_v44, %v422_v6 }
  0xf4   : > { %1150 = vpow2.f32 %v468_v4  ;;  %v457_v9 = vmin.f32 %v1339_v5, 20.0 }
  0xf5   : > { %1152 = vpow2.f32 %v466_v7  ;;  %v456_v10 = vmin.f32 %v1341_v8, 20.0 }
  0xf6   : > { %v1143_v11 = vpop.eup %1142  ;;  %v472_v12 = vmul.f32 1.442695, %v457_v9 }
  0xf7   : > { %v1145_v14 = vpop.eup %1144  ;;  %v470_v15 = vmul.f32 1.442695, %v456_v10  ;;  %v483_v16 = vadd.f32 1.0, %v1143_v11  ;;  %v486_v23 = vmul.f32 -0.5, %v1143_v11  ;;  %v489_v31 = vand.u32 2147483647, %v1143_v11 }
  0xf8   : > { %1154 = vpow2.f32 %v472_v12  ;;  %v474_v17 = vadd.f32 1.0, %v1145_v14  ;;  %v477_v22 = vmul.f32 -0.5, %v1145_v14  ;;  %v480_v34 = vand.u32 2147483647, %v1145_v14 }
  0xf9   : > { %1156 = vpow2.f32 %v470_v15  ;;  %v487_v35 = vadd.f32 1.0, %v486_v23  ;;  %vm1369_vm5 = vcmp.lt.f32.partialorder %v489_v31, 0.0004427343 }
  0xfa   : > { %v1147_v18 = vpop.eup %1146  ;;  %1158 = vlog2.f32 %v474_v17  ;;  %v478_v33 = vadd.f32 1.0, %v477_v22  ;;  %vm1377_vm7 = vcmp.lt.f32.partialorder %v480_v34, 0.0004427343 }
  0xfb   : > { %v1347_v20 = vpop.eup %1148  ;;  %1160 = vlog2.f32 %v483_v16  ;;  %v501_v21 = vadd.f32 1.0, %v1147_v18  ;;  %v504_v25 = vmul.f32 -0.5, %v1147_v18  ;;  %v507_v42 = vand.u32 2147483647, %v1147_v18 }
  0xfc   : > { %v492_v24 = vadd.f32 1.0, %v1347_v20  ;;  %v495_v27 = vmul.f32 -0.5, %v1347_v20  ;;  %v479_v51 = vmul.f32 %v1145_v14, %v478_v33  ;;  %v488_v54 = vmul.f32 %v1143_v11, %v487_v35 }
  0xfd   : > { %1162 = vlog2.f32 %v501_v21  ;;  %v505_v38 = vadd.f32 1.0, %v504_v25  ;;  %v498_v59 = vand.u32 2147483647, %v1347_v20  ;;  %vm1384_vm8 = vcmp.lt.f32.partialorder %v507_v42, 0.0004427343 }
  0xfe   : > { %v1350_v26 = vpop.eup %1150  ;;  %1164 = vlog2.f32 %v492_v24  ;;  %v496_v41 = vadd.f32 1.0, %v495_v27  ;;  %v439_v42 = vmax.f32 %v1333_v61, 0.0 }
  0xff   : > { %v1354_v28 = vpop.eup %1152  ;;  %v519_v32 = vadd.f32 1.0, %v1350_v26  ;;  %v522_v47 = vmul.f32 -0.5, %v1350_v26  ;;  %v506_v60 = vmul.f32 %v1147_v18, %v505_v38  ;;  %v525_v7 = vand.u32 2147483647, %v1350_v26 }
 0x100   : > { %v510_v36 = vadd.f32 1.0, %v1354_v28  ;;  %v513_v45 = vmul.f32 -0.5, %v1354_v28  ;;  %v497_v63 = vmul.f32 %v1347_v20, %v496_v41  ;;  %vm499_vm10 = vcmp.lt.f32.partialorder %v498_v59, 0.0004427343  ;;  %v712_v59 = vld [vmem:[%s1512_s5 + $0x28] sm:$0xff] }
 0x101   : > { %1166 = vlog2.f32 %v519_v32  ;;  %v523_v6 = vadd.f32 1.0, %v522_v47  ;;  %v516_v20 = vand.u32 2147483647, %v1354_v28  ;;  %vm1413_vm11 = vcmp.lt.f32.partialorder %v525_v7, 0.0004427343 }
 0x102   : > { %v1363_v39 = vpop.eup %1154  ;;  %1168 = vlog2.f32 %v510_v36  ;;  %v514_v4 = vadd.f32 1.0, %v513_v45  ;;  %v438_v38 = vmax.f32 %v1335_v0, 0.0 }
 0x103   : > { %v1367_v43 = vpop.eup %1156  ;;  %v537_v49 = vadd.f32 1.0, %v1363_v39  ;;  %v540_v13 = vmul.f32 -0.5, %v1363_v39  ;;  %v524_v23 = vmul.f32 %v1350_v26, %v523_v6  ;;  %v543_v26 = vand.u32 2147483647, %v1363_v39 }
 0x104   : > { %v1159_v50 = vpop.eup %1158  ;;  %v528_v55 = vadd.f32 1.0, %v1367_v43  ;;  %v531_v17 = vmul.f32 -0.5, %v1367_v43  ;;  %vm517_vm12 = vcmp.lt.f32.partialorder %v516_v20, 0.0004427343 }
 0x105   : > { %v1161_v57 = vpop.eup %1160  ;;  %v476_v58 = vmul.f32 0.6931472, %v1159_v50  ;;  %1170 = vlog2.f32 %v537_v49  ;;  %v541_v31 = vadd.f32 1.0, %v540_v13  ;;  %vm544_vm14 = vcmp.lt.f32.partialorder %v543_v26, 0.0004427343 }
 0x106   : > { %v485_v62 = vmul.f32 0.6931472, %v1161_v57  ;;  %1172 = vlog2.f32 %v528_v55  ;;  %v532_v34 = vadd.f32 1.0, %v531_v17 }
 0x107   : > { %v1163_v2 = vpop.eup %1162  ;;  %v482_v3 = vsel %vm1377_vm7, %v479_v51, %v476_v58  ;;  %v542_v45 = vmul.f32 %v1363_v39, %v541_v31  ;;  %v711_v58 = vld [vmem:[%s1512_s5 + $0x20] sm:$0xff] }
 0x108   : > { %v1165_v9 = vpop.eup %1164  ;;  %v546_v10 = vsel %vm442_vm3, %v1323_v48, %v482_v3  ;;  %v491_v11 = vsel %vm1369_vm5, %v488_v54, %v485_v62  ;;  %v503_v12 = vmul.f32 0.6931472, %v1163_v2  ;;  %v533_v50 = vmul.f32 %v1367_v43, %v532_v34 }
 0x109   : > { %v554_v14 = vsel %vm433_vm1, %v434_v29, %v546_v10  ;;  %v547_v15 = vsel %vm443_vm2, %v1321_v46, %v491_v11  ;;  %v494_v16 = vmul.f32 0.6931472, %v1165_v9  ;;  %v515_v29 = vmul.f32 %v1354_v28, %v514_v4 }
 0x10a   : > { %1046 = vmatprep.mubr.f32.mxu1 %v554_v14  ;;  %v555_v48 = vsel %vm433_vm1, %v435_v30, %v547_v15  ;;  %v509_v18 = vsel %vm1384_vm8, %v506_v60, %v503_v12  ;;  %v534_v28 = vand.u32 2147483647, %v1367_v43  ;;  %vm449_vm2 = vcmp.gt.f32.partialorder %v1339_v5, 20.0 }
 0x10b   : > { %v1167_v21 = vpop.eup %1166  ;;  %1047 = vmatmul.mubr.f32.vlgmr.msra.gmra.mrb[0].mxu1 %v555_v48  ;;  %v500_v22 = vsel %vm499_vm10, %v497_v63, %v494_v16  ;;  %v549_v46 = vsel %vm445_vm4, %v1327_v53, %v509_v18  ;;  %vm448_vm3 = vcmp.gt.f32.partialorder %v1341_v8, 20.0  ;;  %v441_v43 = vmax.f32 %v1339_v5, 0.0 }
 0x10c   : > { %v1169_v25 = vpop.eup %1168  ;;  %v548_v27 = vsel %vm444_vm6, %v1329_v56, %v500_v22  ;;  %v521_v30 = vmul.f32 0.6931472, %v1167_v21  ;;  %v557_v35 = vsel %vm433_vm1, %v437_v37, %v549_v46  ;;  %vm535_vm15 = vcmp.lt.f32.partialorder %v534_v28, 0.0004427343 }
 0x10d   : > { %v556_v32 = vsel %vm433_vm1, %v436_v40, %v548_v27  ;;  %v512_v33 = vmul.f32 0.6931472, %v1169_v25  ;;  %v1130_v60 = vpack.c.bf16 %v712_v59, %v711_v58  ;;  %vm720_vm4 = vcmask 392192  }
 0x10e   : > { %1049 = vmatprep.mubr.f32.mxu1 %v556_v32  ;;  %v527_v56 = vsel %vm1413_vm11, %v524_v23, %v521_v30 }
 0x10f   : > { %v1171_v36 = vpop.eup %1170  ;;  %1050 = vmatmul.mubr.f32.gmra.mrb[2].mxu1 %v557_v35  ;;  %v518_v40 = vsel %vm517_vm12, %v515_v29, %v512_v33  ;;  %v551_v53 = vsel %vm447_vm9, %v1333_v61, %v527_v56  ;;  %v440_v61 = vmax.f32 %v1341_v8, 0.0  ;;  %1131 = vmatprep.subr.bf16.mxu0 %v1130_v60  ;;  %v933_v33 = vld [vmem:[%s1513_s6] ss:$0 sm:$0xff] }
 0x110   : > { %v1173_v41 = vpop.eup %1172  ;;  %v550_v37 = vsel %vm446_vm13, %v1335_v0, %v518_v40  ;;  %v539_v44 = vmul.f32 0.6931472, %v1171_v36  ;;  %v559_v51 = vsel %vm433_vm1, %v439_v42, %v551_v53  ;;  %1133 = vmatpush3.bf16.msra.mxu0 %v1130_v60 }
 0x111   : > { %v558_v47 = vsel %vm433_vm1, %v438_v38, %v550_v37  ;;  %v530_v49 = vmul.f32 0.6931472, %v1173_v41 }
 0x112   : > { %1052 = vmatprep.mubr.f32.mxu1 %v558_v47  ;;  %v545_v0 = vsel %vm544_vm14, %v542_v45, %v539_v44 }
 0x113   : > { %1053 = vmatmul.mubr.f32.gmra.mrb[4].mxu1 %v559_v51  ;;  %v536_v39 = vsel %vm535_vm15, %v533_v50, %v530_v49  ;;  %v553_v52 = vsel %vm449_vm2, %v1339_v5, %v545_v0  ;;  %v932_v5 = vld [vmem:[%s1511_s4] ss:$0 sm:$0xff] }
 0x114   : > { %v552_v54 = vsel %vm448_vm3, %v1341_v8, %v536_v39  ;;  %v561_v57 = vsel %vm433_vm1, %v441_v43, %v553_v52 }
 0x115   : > { %v560_v55 = vsel %vm433_vm1, %v440_v61, %v552_v54  ;;  %vm690_vm1 = vcmp.lt.s32.totalorder %v1345_v19, 32 }
 0x116   : > { %1055 = vmatprep.mubr.f32.mxu1 %v560_v55 }
 0x117   : > { %1056 = vmatmul.mubr.f32.gmra.mrb[6].mxu1 %v561_v57 }
 0x1de   : > { %v1048_v8 = vpop.f32.mrb[0].mxu1 }
 0x1df   : > { %v657_v62 = vadd.f32 %v1048_v8, %v932_v5  ;;  %v651_v63 = vpop.f32.mrb[1].mxu1 }
 0x1e0   : > { %v652_v1 = vadd.f32 %v932_v5, %v651_v63 }
 0x1e1   : > { %v692_v2 = vmax.f32 %v657_v62, 0.0 }
 0x1e2   : > { %v691_v3 = vmax.f32 %v652_v1, 0.0  ;;  %v1051_v4 = vpop.f32.mrb[2].mxu1 }
 0x1e3   : > { %v700_v6 = vsel %vm690_vm1, %v692_v2, %v657_v62  ;;  %v667_v7 = vadd.f32 %v1051_v4, %v932_v5  ;;  %v661_v9 = vpop.f32.mrb[3].mxu1 }
 0x1e4   : > { %v662_v10 = vadd.f32 %v932_v5, %v661_v9  ;;  %v699_v11 = vsel %vm690_vm1, %v691_v3, %v652_v1 }
 0x1e5   : > { %v694_v12 = vmax.f32 %v667_v7, 0.0  ;;  %1070 = vmatprep.mubr.msk.f32.mxu0 %vm720_vm4, %v699_v11 }
 0x1e6   : > { %v693_v13 = vmax.f32 %v662_v10, 0.0  ;;  %v1054_v14 = vpop.f32.mrb[4].mxu1  ;;  %1071 = vmatmul.mubr.msk.f32.vlgmr.msra.gmra.mrb[8].mxu0 %vm720_vm4, %v700_v6 }
 0x1e7   : > { %v677_v15 = vadd.f32 %v1054_v14, %v932_v5  ;;  %v671_v16 = vpop.f32.mrb[5].mxu1  ;;  %v702_v17 = vsel %vm690_vm1, %v694_v12, %v667_v7 }
 0x1e8   : > { %v672_v48 = vadd.f32 %v932_v5, %v671_v16  ;;  %v701_v18 = vsel %vm690_vm1, %v693_v13, %v662_v10 }
 0x1e9   : > { %v696_v20 = vmax.f32 %v677_v15, 0.0  ;;  %1073 = vmatprep.mubr.msk.f32.mxu0 %vm720_vm4, %v701_v18 }
 0x1ea   : > { %v695_v21 = vmax.f32 %v672_v48, 0.0  ;;  %v1057_v22 = vpop.f32.mrb[6].mxu1  ;;  %1074 = vmatmul.mubr.msk.f32.gmra.mrb[10].mxu0 %vm720_vm4, %v702_v17 }
 0x1eb   : > { %v687_v46 = vadd.f32 %v1057_v22, %v932_v5  ;;  %v681_v23 = vpop.f32.mrb[7].mxu1  ;;  %v704_v24 = vsel %vm690_vm1, %v696_v20, %v677_v15 }
 0x1ec   : > { %v682_v25 = vadd.f32 %v932_v5, %v681_v23  ;;  %v703_v27 = vsel %vm690_vm1, %v695_v21, %v672_v48 }
 0x1ed   : > { %v698_v29 = vmax.f32 %v687_v46, 0.0  ;;  %1076 = vmatprep.mubr.msk.f32.mxu0 %vm720_vm4, %v703_v27 }
 0x1ee   : > { %v697_v30 = vmax.f32 %v682_v25, 0.0  ;;  %1077 = vmatmul.mubr.msk.f32.gmra.mrb[12].mxu0 %vm720_vm4, %v704_v24 }
 0x1ef   : > { %v706_v31 = vsel %vm690_vm1, %v698_v29, %v687_v46 }
 0x1f0   : > { %v705_v32 = vsel %vm690_vm1, %v697_v30, %v682_v25 }
 0x1f1   : > { %1079 = vmatprep.mubr.msk.f32.mxu0 %vm720_vm4, %v705_v32 }
 0x1f2   : > { %1080 = vmatmul.mubr.msk.f32.gmra.mrb[14].mxu0 %vm720_vm4, %v706_v31 }
 0x2b9   : > { %v1072_v34 = vpop.f32.mrb[8].mxu0 }
 0x2ba   : > { %v817_v26 = vadd.f32 %v1072_v34, %v933_v33  ;;  %v811_v35 = vpop.f32.mrb[9].mxu0 }
 0x2bb   : > { %v812_v56 = vadd.f32 %v933_v33, %v811_v35 }
 0x2bc   : > { %851 = vst.msk [vmem:[%s280_s29 + $0x8] sm:$0xff] %vm301_vm0, %v817_v26 }
 0x2bd   : > { %850 = vst.msk [vmem:[%s280_s29] sm:$0xff] %vm301_vm0, %v812_v56  ;;  %v1075_v19 = vpop.f32.mrb[10].mxu0 }
 0x2be   : > { %v827_v28 = vadd.f32 %v1075_v19, %v933_v33  ;;  %v821_v36 = vpop.f32.mrb[11].mxu0 }
 0x2bf   : > { %v822_v38 = vadd.f32 %v933_v33, %v821_v36 }
 0x2c0   : > { %853 = vst.msk [vmem:[%s280_s29 + $0x18] sm:$0xff] %vm301_vm0, %v827_v28 }
 0x2c1   : > { %852 = vst.msk [vmem:[%s280_s29 + $0x10] sm:$0xff] %vm301_vm0, %v822_v38  ;;  %v1078_v40 = vpop.f32.mrb[12].mxu0 }
 0x2c2   : > { %v837_v53 = vadd.f32 %v1078_v40, %v933_v33  ;;  %v831_v41 = vpop.f32.mrb[13].mxu0 }
 0x2c3   : > { %v832_v37 = vadd.f32 %v933_v33, %v831_v41 }
 0x2c4   : > { %855 = vst.msk [vmem:[%s280_s29 + $0x28] sm:$0xff] %vm301_vm0, %v837_v53 }
 0x2c5   : > { %854 = vst.msk [vmem:[%s280_s29 + $0x20] sm:$0xff] %vm301_vm0, %v832_v37  ;;  %v1081_v42 = vpop.f32.mrb[14].mxu0 }
 0x2c6   : > { %v847_v44 = vadd.f32 %v1081_v42, %v933_v33  ;;  %v841_v45 = vpop.f32.mrb[15].mxu0 }
 0x2c7   : > { %v842_v47 = vadd.f32 %v933_v33, %v841_v45 }
 0x2c8   : > { %857 = vst.msk [vmem:[%s280_s29 + $0x38] sm:$0xff] %vm301_vm0, %v847_v44 }
 0x2c9   : > { %856 = vst.msk [vmem:[%s280_s29 + $0x30] sm:$0xff] %vm301_vm0, %v842_v47 }
 0x2ca PF: > { %s17_s24 = sadd.s32 1, %s1180_s24  }
 0x2cb   : > { %p14_p4 = scmp.ge.s32.totalorder %s17_s24, 6  }
 0x2cd   :  { %16 = sbr.rel (!%p14_p4) target bundleno = 1 (0x1), region = 78 }

</bundles_post_ra>
